<compile_context>
chip_gen: v7x
topology: tpu7x:2x2x1
jax: 0.10.0
libtpu: 0.0.40
codegen_flags: <defaults>
</compile_context>

<pallas_src>
import functools

import jax
import jax.numpy as jnp
from jax.experimental import pallas as pl
from jax.experimental.pallas import tpu as pltpu


def _round_up(x, m):
    return ((x + m - 1) // m) * m


def _chip_profile():
    """Best-effort chip heuristics: (default row tile, VMEM bytes, #TensorCores)."""
    kind = ""
    try:
        kind = jax.devices()[0].device_kind.lower()
    except Exception:
        pass
    vmem_cap = None
    try:
        vmem_cap = int(pltpu.get_tpu_info().vmem_capacity_bytes)
    except Exception:
        pass
    if "v7" in kind:
        tm_def, n_cores, vmem_default = 512, 2, 64 << 20
    elif "v6" in kind:
        tm_def, n_cores, vmem_default = 1024, 1, 128 << 20
    elif "v5" in kind:
        tm_def, n_cores, vmem_default = 256, 1, 128 << 20
    else:  # unknown -> conservative defaults that work everywhere
        tm_def, n_cores, vmem_default = 256, 1, 64 << 20
    if vmem_cap is None:
        vmem_cap = vmem_default
    return tm_def, vmem_cap, n_cores


def _pick_tf(d_ff, tf):
    """Largest 128-multiple hidden tile (<= tf) dividing d_ff; else pad d_ff."""
    tf = max(128, min(_round_up(tf, 128), _round_up(d_ff, 128)))
    cand = tf - tf % 128
    while cand >= 128:
        if d_ff % cand == 0:
            return cand, d_ff
        cand -= 128
    # No 128-multiple divisor: zero-pad d_ff.  Padded W1 columns / b1 entries /
    # W2 rows are zero, so they contribute exactly 0 to the accumulator.
    tf = max(128, tf - tf % 128)
    return tf, _round_up(d_ff, tf)


def ffn_kernel(x_ref, w1_ref, b1_ref, w2_ref, b2_ref, o_ref, acc_ref):
    f = pl.program_id(1)

    # In-kernel activation cast: x is DMA'd once per row tile in its original
    # dtype; casting here removes a whole wrapper-side pass over HBM.
    x = x_ref[...].astype(w1_ref.dtype)
    # First matmul on the MXU, f32 accumulation.
    h = jnp.dot(x, w1_ref[...], preferred_element_type=jnp.float32)
    # Bias + ReLU in f32 on the VPU (v5e has no bf16 VPU path).
    h = jnp.maximum(h + b1_ref[...], 0.0)
    # Second matmul: partial product over this d_ff block, f32 accumulation.
    part = jnp.dot(h.astype(w2_ref.dtype), w2_ref[...],
                   preferred_element_type=jnp.float32)

    @pl.when(f == 0)
    def _():
        acc_ref[...] = part            # lazy init: no separate zero pass

    @pl.when(f > 0)
    def _():
        acc_ref[...] += part

    @pl.when(f == pl.num_programs(1) - 1)
    def _():
        o_ref[...] = (acc_ref[...] + b2_ref[...]).astype(o_ref.dtype)


@functools.partial(
    jax.jit,
    static_argnames=("tm_eff", "tf_eff", "d_ff_pad", "compute_dtype",
                     "vmem_limit"))
def _ffn_call(x2d, w1, b1, w2, b2, *, tm_eff, tf_eff, d_ff_pad, compute_dtype,
              vmem_limit):
    M, d_model = x2d.shape
    d_ff = w1.shape[1]
    out_dtype = x2d.dtype

    # Weights / biases in their kernel dtypes (weights bf16 -> half the HBM
    # traffic on the re-streamed operands; biases stay f32 for the epilogue).
    w1c = w1.astype(compute_dtype)
    w2c = w2.astype(compute_dtype)
    b1f = b1.reshape(1, d_ff).astype(jnp.float32)
    b2f = b2.reshape(1, d_model).astype(jnp.float32)
    if d_ff_pad != d_ff:
        w1c = jnp.pad(w1c, ((0, 0), (0, d_ff_pad - d_ff)))
        b1f = jnp.pad(b1f, ((0, 0), (0, d_ff_pad - d_ff)))
        w2c = jnp.pad(w2c, ((0, d_ff_pad - d_ff), (0, 0)))

    n_row = pl.cdiv(M, tm_eff)      # ragged last tile handled by masked writes
    n_ff = d_ff_pad // tf_eff
    grid = (n_row, n_ff)

    # W1 / W2 are the only operands whose block index changes every inner step:
    # triple-buffer them (when there are enough steps for it to matter).
    if n_ff >= 3:
        w1_spec = pl.BlockSpec((d_model, tf_eff), lambda i, f: (0, f),
                               pipeline_mode=pl.Buffered(3))
        w2_spec = pl.BlockSpec((tf_eff, d_model), lambda i, f: (f, 0),
                               pipeline_mode=pl.Buffered(3))
    else:
        w1_spec = pl.BlockSpec((d_model, tf_eff), lambda i, f: (0, f))
        w2_spec = pl.BlockSpec((tf_eff, d_model), lambda i, f: (f, 0))

    csz = jnp.dtype(compute_dtype).itemsize
    flops = 4 * M * d_model * d_ff                      # two matmuls
    bytes_accessed = int(M * d_model * x2d.dtype.itemsize            # x read
                         + n_row * 2 * d_model * d_ff_pad * csz      # W1+W2 re-streamed
                         + (d_ff_pad + d_model) * 4                  # biases
                         + M * d_model * jnp.dtype(out_dtype).itemsize)

    out2d = pl.pallas_call(
        ffn_kernel,
        out_shape=jax.ShapeDtypeStruct((M, d_model), out_dtype),
        grid_spec=pltpu.PrefetchScalarGridSpec(
            num_scalar_prefetch=0,
            grid=grid,
            in_specs=[
                # token-row tile of the input (original dtype; cast in-kernel)
                pl.BlockSpec((tm_eff, d_model), lambda i, f: (i, 0)),
                w1_spec,                                    # W1 blocked along d_ff
                pl.BlockSpec((1, tf_eff), lambda i, f: (0, f)),   # b1 block
                w2_spec,                                    # W2 blocked along d_ff
                pl.BlockSpec((1, d_model), lambda i, f: (0, 0)),  # b2 full
            ],
            out_specs=pl.BlockSpec((tm_eff, d_model), lambda i, f: (i, 0)),
            scratch_shapes=[pltpu.VMEM((tm_eff, d_model), jnp.float32)],
        ),
        compiler_params=pltpu.CompilerParams(
            dimension_semantics=("parallel", "arbitrary"),
            vmem_limit_bytes=vmem_limit),
        cost_estimate=pl.CostEstimate(flops=flops,
                                      bytes_accessed=bytes_accessed,
                                      transcendentals=0),
    )(x2d, w1c, b1f, w2c, b2f)
    return out2d


def feed_forward(data, w1, b1, w2, b2, *, tm=None, tf=1024,
                 compute_dtype=jnp.bfloat16):
    """data: (batch, seq, d_model). Returns same shape/dtype.

    w1: (d_model, 4*d_model), b1: (4*d_model,), w2: (4*d_model, d_model),
    b2: (d_model,).  Equivalent to PyTorch's x @ W.T + b with W = (out, in).
    Dropout is identity (eval mode).
    """
    batch, seq, d_model = data.shape
    d_ff = w1.shape[1]
    M = batch * seq

    tm_def, vmem_cap, n_cores = _chip_profile()
    if tm is None:
        tm = tm_def

    tf_eff, d_ff_pad = _pick_tf(d_ff, tf)

    # Row tile: multiple of 8, shrunk for tiny M; on multi-TC chips cap it so
    # the "parallel" row axis has at least one block per TensorCore.
    tm_eff = max(8, min(_round_up(tm, 8), _round_up(M, 8)))
    if n_cores > 1:
        per_core = _round_up(pl.cdiv(M, n_cores), 8)
        if per_core >= 256:
            tm_eff = min(tm_eff, per_core)

    # VMEM estimate: double-buffered x/out/bias tiles, triple-buffered weight
    # streams, resident f32 accumulator.  Shrink tm if it would not fit.
    csz = jnp.dtype(compute_dtype).itemsize
    xsz = jnp.dtype(data.dtype).itemsize
    osz = xsz

    def _vmem_needed(tm_e):
        return (2 * tm_e * d_model * xsz
                + 3 * d_model * tf_eff * csz
                + 3 * tf_eff * d_model * csz
                + 2 * tf_eff * 4 + 2 * d_model * 4
                + 2 * tm_e * d_model * osz
                + tm_e * d_model * 4)

    budget = int(0.85 * vmem_cap)
    while tm_eff > 128 and _vmem_needed(tm_eff) > budget:
        tm_eff = max(128, _round_up(tm_eff // 2, 8))

    vmem_limit = int(min(max(_vmem_needed(tm_eff) + (4 << 20), 16 << 20),
                         vmem_cap - (2 << 20)))

    x2d = data.reshape(M, d_model)     # no wrapper cast/pad pass
    out2d = _ffn_call(x2d, w1, b1, w2, b2,
                      tm_eff=int(tm_eff), tf_eff=int(tf_eff),
                      d_ff_pad=int(d_ff_pad), compute_dtype=compute_dtype,
                      vmem_limit=int(vmem_limit))
    return out2d.reshape(batch, seq, d_model)


def init_params(key, d_model, dtype=jnp.float32):
    """Deterministic init mirroring nn.Linear shapes (stored as (in, out))."""
    d_ff = 4 * d_model
    k1, k2, k3, k4 = jax.random.split(key, 4)
    lim1 = 1.0 / jnp.sqrt(d_model)
    lim2 = 1.0 / jnp.sqrt(d_ff)
    w1 = jax.random.uniform(k1, (d_model, d_ff), dtype, -lim1, lim1)
    b1 = jax.random.uniform(k2, (d_ff,), dtype, -lim1, lim1)
    w2 = jax.random.uniform(k3, (d_ff, d_model), dtype, -lim2, lim2)
    b2 = jax.random.uniform(k4, (d_model,), dtype, -lim2, lim2)
    return w1, b1, w2, b2


def _ref_bf16(data, w1, b1, w2, b2, compute_dtype=jnp.bfloat16):
    """Pure-JAX reference using the same bf16-operand / f32-accum recipe."""
    x = data.astype(compute_dtype)
    h = jnp.dot(x, w1.astype(compute_dtype),
                preferred_element_type=jnp.float32) + b1
    h = jnp.maximum(h, 0.0)
    out = jnp.dot(h.astype(compute_dtype), w2.astype(compute_dtype),
                  preferred_element_type=jnp.float32) + b2
    return out.astype(data.dtype)


def _ref_f32(data, w1, b1, w2, b2):
    return jnp.maximum(data @ w1 + b1, 0.0) @ w2 + b2


if __name__ == "__main__":
    key = jax.random.PRNGKey(0)
    kx, kp, ky = jax.random.split(key, 3)

    # Small shapes consistent with the module; d_model=128 keeps the output
    # tile lane-dense.  d_ff = 4*d_model = 512.
    batch, seq, d_model = 2, 8, 128
    data = jax.random.normal(kx, (batch, seq, d_model), dtype=jnp.float32)
    w1, b1, w2, b2 = init_params(kp, d_model)

    out = jax.block_until_ready(feed_forward(data, w1, b1, w2, b2))
    assert out.shape == data.shape

    ref_b = _ref_bf16(data, w1, b1, w2, b2)
    assert jnp.allclose(out, ref_b, atol=2e-3, rtol=2e-3), \
        "mismatch vs bf16-operand reference"
    ref_f = _ref_f32(data, w1, b1, w2, b2)
    assert jnp.allclose(out, ref_f, atol=1e-1, rtol=1e-1), \
        "mismatch vs f32 reference (semantics)"

    # Second case: M = batch*seq not a multiple of 8 -> exercises the masked
    # (pl.cdiv) ragged last row tile.
    batch2, seq2 = 3, 5
    data2 = jax.random.normal(ky, (batch2, seq2, d_model), dtype=jnp.float32)
    out2 = jax.block_until_ready(feed_forward(data2, w1, b1, w2, b2))
    ref2 = _ref_bf16(data2, w1, b1, w2, b2)
    assert out2.shape == data2.shape
    assert jnp.allclose(out2, ref2, atol=2e-3, rtol=2e-3), \
        "mismatch vs reference (ragged M)"

    print("KERNEL_OK")
</pallas_src>

<mosaic_0001>
module attributes {stable_mosaic.version = 11 : i64} {
  func.func @ffn_kernel(%arg0: i32, %arg1: i32, %arg2: memref<16x128xf32, #tpu.memory_space<vmem>>, %arg3: memref<128x512xbf16, #tpu.memory_space<vmem>>, %arg4: memref<1x512xf32, #tpu.memory_space<vmem>>, %arg5: memref<512x128xbf16, #tpu.memory_space<vmem>>, %arg6: memref<1x128xf32, #tpu.memory_space<vmem>>, %arg7: memref<16x128xf32, #tpu.memory_space<vmem>>, %arg8: memref<16x128xf32, #tpu.memory_space<vmem>>) attributes {dimension_semantics = [#tpu.dimension_semantics<parallel>, #tpu.dimension_semantics<arbitrary>], iteration_bounds = array<i64: 1, 1>, scalar_prefetch = 0 : i64, scratch_operands = 1 : i64, tpu.core_type = #tpu.core_type<tc>, window_params = [{transform_indices = @transform_0, window_bounds = array<i64: 16, 128>}, {transform_indices = @transform_1, window_bounds = array<i64: 128, 512>}, {transform_indices = @transform_2, window_bounds = array<i64: 1, 512>}, {transform_indices = @transform_3, window_bounds = array<i64: 512, 128>}, {pipeline_mode = #tpu.pipeline_mode<synchronous>, transform_indices = @transform_4, window_bounds = array<i64: 1, 128>}, {transform_indices = @transform_5, window_bounds = array<i64: 16, 128>}]} {
    %c0 = arith.constant 0 : index
    %c0_0 = arith.constant 0 : index
    %0 = vector.load %arg2[%c0, %c0_0] : memref<16x128xf32, #tpu.memory_space<vmem>>, vector<16x128xf32>
    %1 = arith.truncf %0 : vector<16x128xf32> to vector<16x128xbf16>
    %c0_1 = arith.constant 0 : index
    %c0_2 = arith.constant 0 : index
    %2 = vector.load %arg3[%c0_1, %c0_2] : memref<128x512xbf16, #tpu.memory_space<vmem>>, vector<128x512xbf16>
    %cst = arith.constant dense<0.000000e+00> : vector<16x512xf32>
    %3 = tpu.matmul %1, %2, %cst {dimension_numbers = #tpu.dot_dimension_numbers<[1], [0], [0], [1], [0, 0, 1, 1], [], []>} : vector<16x128xbf16>, vector<128x512xbf16>, vector<16x512xf32> -> vector<16x512xf32>
    %c0_3 = arith.constant 0 : index
    %c0_4 = arith.constant 0 : index
    %4 = vector.load %arg4[%c0_3, %c0_4] : memref<1x512xf32, #tpu.memory_space<vmem>>, vector<1x512xf32>
    %5 = vector.broadcast %4 : vector<1x512xf32> to vector<16x512xf32>
    %6 = arith.addf %3, %5 : vector<16x512xf32>
    %cst_5 = arith.constant 0.000000e+00 : f32
    %7 = vector.broadcast %cst_5 : f32 to vector<16x512xf32>
    %8 = arith.maximumf %6, %7 : vector<16x512xf32>
    %9 = arith.truncf %8 : vector<16x512xf32> to vector<16x512xbf16>
    %c0_6 = arith.constant 0 : index
    %c0_7 = arith.constant 0 : index
    %10 = vector.load %arg5[%c0_6, %c0_7] : memref<512x128xbf16, #tpu.memory_space<vmem>>, vector<512x128xbf16>
    %cst_8 = arith.constant dense<0.000000e+00> : vector<16x128xf32>
    %11 = tpu.matmul %9, %10, %cst_8 {dimension_numbers = #tpu.dot_dimension_numbers<[1], [0], [0], [1], [0, 0, 1, 1], [], []>} : vector<16x512xbf16>, vector<512x128xbf16>, vector<16x128xf32> -> vector<16x128xf32>
    %c0_i32 = arith.constant 0 : i32
    %12 = arith.cmpi eq, %arg1, %c0_i32 : i32
    %13 = arith.extui %12 : i1 to i32
    %c0_i32_9 = arith.constant 0 : i32
    %14 = arith.cmpi ne, %13, %c0_i32_9 : i32
    scf.if %14 {
      %c0_14 = arith.constant 0 : index
      %c0_15 = arith.constant 0 : index
      %21 = vector.load %arg8[%c0_14, %c0_15] : memref<16x128xf32, #tpu.memory_space<vmem>>, vector<16x128xf32>
      tpu.vector_store %arg8[%c0_14, %c0_15], %11 {strides = array<i32>} : memref<16x128xf32, #tpu.memory_space<vmem>>, vector<16x128xf32>,
    } else {
    }
    %c0_i32_10 = arith.constant 0 : i32
    %15 = arith.cmpi sgt, %arg1, %c0_i32_10 : i32
    %16 = arith.extui %15 : i1 to i32
    %c0_i32_11 = arith.constant 0 : i32
    %17 = arith.cmpi ne, %16, %c0_i32_11 : i32
    scf.if %17 {
      %c0_14 = arith.constant 0 : index
      %c0_15 = arith.constant 0 : index
      %21 = vector.load %arg8[%c0_14, %c0_15] : memref<16x128xf32, #tpu.memory_space<vmem>>, vector<16x128xf32>
      %22 = arith.addf %21, %11 : vector<16x128xf32>
      %c0_16 = arith.constant 0 : index
      %c0_17 = arith.constant 0 : index
      %23 = vector.load %arg8[%c0_16, %c0_17] : memref<16x128xf32, #tpu.memory_space<vmem>>, vector<16x128xf32>
      tpu.vector_store %arg8[%c0_16, %c0_17], %22 {strides = array<i32>} : memref<16x128xf32, #tpu.memory_space<vmem>>, vector<16x128xf32>,
    } else {
    }
    %c0_i32_12 = arith.constant 0 : i32
    %18 = arith.cmpi eq, %arg1, %c0_i32_12 : i32
    %19 = arith.extui %18 : i1 to i32
    %c0_i32_13 = arith.constant 0 : i32
    %20 = arith.cmpi ne, %19, %c0_i32_13 : i32
    scf.if %20 {
      %c0_14 = arith.constant 0 : index
      %c0_15 = arith.constant 0 : index
      %21 = vector.load %arg8[%c0_14, %c0_15] : memref<16x128xf32, #tpu.memory_space<vmem>>, vector<16x128xf32>
      %c0_16 = arith.constant 0 : index
      %c0_17 = arith.constant 0 : index
      %22 = vector.load %arg6[%c0_16, %c0_17] : memref<1x128xf32, #tpu.memory_space<vmem>>, vector<1x128xf32>
      %23 = vector.broadcast %22 : vector<1x128xf32> to vector<16x128xf32>
      %24 = arith.addf %21, %23 : vector<16x128xf32>
      %c0_18 = arith.constant 0 : index
      %c0_19 = arith.constant 0 : index
      %25 = vector.load %arg7[%c0_18, %c0_19] : memref<16x128xf32, #tpu.memory_space<vmem>>, vector<16x128xf32>
      tpu.vector_store %arg7[%c0_18, %c0_19], %24 {strides = array<i32>} : memref<16x128xf32, #tpu.memory_space<vmem>>, vector<16x128xf32>,
    } else {
    }
    return
  }
  func.func @transform_0(%arg0: i32, %arg1: i32) -> (i32, i32) {
    %c0_i32 = arith.constant 0 : i32
    %c0_i32_0 = arith.constant 0 : i32
    return %arg0, %c0_i32 : i32, i32
  }
  func.func @transform_1(%arg0: i32, %arg1: i32) -> (i32, i32) {
    %c0_i32 = arith.constant 0 : i32
    %c0_i32_0 = arith.constant 0 : i32
    return %c0_i32, %arg1 : i32, i32
  }
  func.func @transform_2(%arg0: i32, %arg1: i32) -> (i32, i32) {
    %c0_i32 = arith.constant 0 : i32
    %c0_i32_0 = arith.constant 0 : i32
    return %c0_i32, %arg1 : i32, i32
  }
  func.func @transform_3(%arg0: i32, %arg1: i32) -> (i32, i32) {
    %c0_i32 = arith.constant 0 : i32
    %c0_i32_0 = arith.constant 0 : i32
    return %arg1, %c0_i32 : i32, i32
  }
  func.func @transform_4(%arg0: i32, %arg1: i32) -> (i32, i32) {
    %c0_i32 = arith.constant 0 : i32
    %c0_i32_0 = arith.constant 0 : i32
    %c0_i32_1 = arith.constant 0 : i32
    return %c0_i32, %c0_i32_0 : i32, i32
  }
  func.func @transform_5(%arg0: i32, %arg1: i32) -> (i32, i32) {
    %c0_i32 = arith.constant 0 : i32
    %c0_i32_0 = arith.constant 0 : i32
    return %arg0, %c0_i32 : i32, i32
  }
}

</mosaic_0001>

<bundles_post_ra>
// kernel: _ffn_call.1
= control target key start
LH: loop header
LB: loop body
LE: loop exit
PB: predicated region body
PF: predicated region fallthrough
CT: control target
= control target key end

     0   :  { %v940_v2 = vmov 0   ;;  %s1190_s0 = inlined_call_operand.vmem [shape: f32[16,128], index: 0, kind: input, shape index: {}]   ;;  %s1191_s1 = inlined_call_operand.vmem [shape: bf16[128,512], index: 1, kind: input, shape index: {}]   ;;  %s1192_s2 = inlined_call_operand.vmem [shape: f32[1,512], index: 2, kind: input, shape index: {}]   ;;  %s1193_s3 = inlined_call_operand.vmem [shape: bf16[512,128], index: 3, kind: input, shape index: {}]   ;;  %s1194_s4 = inlined_call_operand.vmem [shape: f32[1,128], index: 4, kind: input, shape index: {}]   ;;  %s1195_s5 = inlined_call_operand.hbm [shape: f32[16,128], index: 5, kind: output, shape index: {}]  }
   0x1   :  { %v836_v0 = vld [vmem:[%s1191_s1 + $0x4] ss:$16 sps:$4 sm:$0xff]   ;;  %v838_v1 = vld [vmem:[%s1191_s1 + $0xc] ss:$16 sps:$4 sm:$0xff]   ;;  %271 = vmatprep.mubr.bf16.mxu0 %v940_v2  ;;  %314 = vmatprep.mubr.bf16.mxu1 %v940_v2  ;;  %v840_v3 = vld [vmem:[%s1191_s1] ss:$16 sps:$4 sm:$0xff]  }
   0x2   :  { %239 = vmatprep.subr.bf16.mxu0 %v836_v0  ;;  %v841_v4 = vld [vmem:[%s1191_s1 + $0x8] ss:$16 sps:$4 sm:$0xff]   ;;  %282 = vmatprep.subr.bf16.mxu1 %v838_v1  ;;  %v842_v5 = vld [vmem:[%s1191_s1 + $0x24] ss:$16 sps:$4 sm:$0xff]   ;;  %v844_v6 = vld [vmem:[%s1191_s1 + $0x2c] ss:$16 sps:$4 sm:$0xff]  }
   0x3   :  { %240 = vmatpush1.bf16.msra.mxu0 %v840_v3  ;;  %283 = vmatpush1.bf16.msra.mxu1 %v841_v4  ;;  %v846_v7 = vld [vmem:[%s1191_s1 + $0x20] ss:$16 sps:$4 sm:$0xff]   ;;  %v847_v8 = vld [vmem:[%s1191_s1 + $0x28] ss:$16 sps:$4 sm:$0xff]   ;;  %v848_v9 = vld [vmem:[%s1191_s1 + $0x44] ss:$16 sps:$4 sm:$0xff]  }
   0x4   :  { %241 = vmatprep.subr.bf16.mxu0 %v842_v5  ;;  %284 = vmatprep.subr.bf16.mxu1 %v844_v6  ;;  %v850_v10 = vld [vmem:[%s1191_s1 + $0x4c] ss:$16 sps:$4 sm:$0xff]   ;;  %v852_v11 = vld [vmem:[%s1191_s1 + $0x40] ss:$16 sps:$4 sm:$0xff]   ;;  %v853_v12 = vld [vmem:[%s1191_s1 + $0x48] ss:$16 sps:$4 sm:$0xff]  }
   0x5   :  { %v854_v13 = vld [vmem:[%s1191_s1 + $0x64] ss:$16 sps:$4 sm:$0xff]   ;;  %v856_v14 = vld [vmem:[%s1191_s1 + $0x6c] ss:$16 sps:$4 sm:$0xff]   ;;  %v858_v15 = vld [vmem:[%s1191_s1 + $0x60] ss:$16 sps:$4 sm:$0xff]  }
   0x6   :  { %v859_v16 = vld [vmem:[%s1191_s1 + $0x68] ss:$16 sps:$4 sm:$0xff]   ;;  %v860_v17 = vld [vmem:[%s1191_s1 + $0x84] ss:$16 sps:$4 sm:$0xff]   ;;  %v862_v18 = vld [vmem:[%s1191_s1 + $0x8c] ss:$16 sps:$4 sm:$0xff]  }
   0x7   :  { %242 = vmatpush1.bf16.msra.mxu0 %v846_v7  ;;  %285 = vmatpush1.bf16.msra.mxu1 %v847_v8  ;;  %v864_v19 = vld [vmem:[%s1191_s1 + $0x80] ss:$16 sps:$4 sm:$0xff]   ;;  %v865_v20 = vld [vmem:[%s1191_s1 + $0x88] ss:$16 sps:$4 sm:$0xff]   ;;  %v866_v21 = vld [vmem:[%s1191_s1 + $0xa4] ss:$16 sps:$4 sm:$0xff]  }
   0x8   :  { %243 = vmatprep.subr.bf16.mxu0 %v848_v9  ;;  %286 = vmatprep.subr.bf16.mxu1 %v850_v10  ;;  %v868_v22 = vld [vmem:[%s1191_s1 + $0xac] ss:$16 sps:$4 sm:$0xff]   ;;  %v870_v23 = vld [vmem:[%s1191_s1 + $0xa0] ss:$16 sps:$4 sm:$0xff]   ;;  %v871_v24 = vld [vmem:[%s1191_s1 + $0xa8] ss:$16 sps:$4 sm:$0xff]  }
   0x9   :  { %v872_v25 = vld [vmem:[%s1191_s1 + $0xc4] ss:$16 sps:$4 sm:$0xff]   ;;  %v874_v26 = vld [vmem:[%s1191_s1 + $0xcc] ss:$16 sps:$4 sm:$0xff]   ;;  %v876_v27 = vld [vmem:[%s1191_s1 + $0xc0] ss:$16 sps:$4 sm:$0xff]  }
   0xa   :  { %v877_v28 = vld [vmem:[%s1191_s1 + $0xc8] ss:$16 sps:$4 sm:$0xff]   ;;  %v878_v29 = vld [vmem:[%s1191_s1 + $0xe4] ss:$16 sps:$4 sm:$0xff]   ;;  %v880_v30 = vld [vmem:[%s1191_s1 + $0xec] ss:$16 sps:$4 sm:$0xff]  }
   0xb   :  { %244 = vmatpush1.bf16.msra.mxu0 %v852_v11  ;;  %287 = vmatpush1.bf16.msra.mxu1 %v853_v12  ;;  %v882_v31 = vld [vmem:[%s1191_s1 + $0xe0] ss:$16 sps:$4 sm:$0xff]   ;;  %v883_v32 = vld [vmem:[%s1191_s1 + $0xe8] ss:$16 sps:$4 sm:$0xff]  }
   0xc   :  { %245 = vmatprep.subr.bf16.mxu0 %v854_v13  ;;  %288 = vmatprep.subr.bf16.mxu1 %v856_v14  ;;  %v22_v33 = vld [vmem:[%s1190_s0] sm:$0xff]  ;;  %v23_v34 = vld [vmem:[%s1190_s0 + $0x8] sm:$0xff]  ;;  %v892_v44 = vld [vmem:[%s1193_s3 + $0x50] sm:$0xff]  }
   0xd   :  { %v884_v35 = vld [vmem:[%s1193_s3 + $0x40] sm:$0xff]   ;;  %v24_v38 = vpack.c.bf16 %v23_v34, %v22_v33  ;;  %v888_v40 = vld [vmem:[%s1193_s3 + $0x48] sm:$0xff]   ;;  %v893_v45 = vld [vmem:[%s1193_s3 + $0xd0] sm:$0xff]  }
   0xe   :  { %v885_v36 = vld [vmem:[%s1193_s3 + $0xc0] sm:$0xff]   ;;  %v889_v41 = vld [vmem:[%s1193_s3 + $0xc8] sm:$0xff]   ;;  %v894_v46 = vld [vmem:[%s1193_s3 + $0x10] sm:$0xff]  }
   0xf   :  { %246 = vmatpush1.bf16.msra.mxu0 %v858_v15  ;;  %289 = vmatpush1.bf16.msra.mxu1 %v859_v16  ;;  %v886_v37 = vld [vmem:[%s1193_s3] sm:$0xff]   ;;  %v890_v42 = vld [vmem:[%s1193_s3 + $0x8] sm:$0xff]   ;;  %v895_v47 = vld [vmem:[%s1193_s3 + $0x90] sm:$0xff]  }
  0x10   :  { %247 = vmatprep.subr.bf16.mxu0 %v860_v17  ;;  %290 = vmatprep.subr.bf16.mxu1 %v862_v18  ;;  %v887_v39 = vld [vmem:[%s1193_s3 + $0x80] sm:$0xff]   ;;  %v891_v43 = vld [vmem:[%s1193_s3 + $0x88] sm:$0xff]   ;;  %v896_v48 = vld [vmem:[%s1193_s3 + $0x58] sm:$0xff]  }
  0x11   :  { %v897_v49 = vld [vmem:[%s1193_s3 + $0xd8] sm:$0xff]   ;;  %v900_v52 = vld [vmem:[%s1193_s3 + $0x60] sm:$0xff]   ;;  %v904_v56 = vld [vmem:[%s1193_s3 + $0x68] sm:$0xff]  }
  0x12   :  { %v898_v50 = vld [vmem:[%s1193_s3 + $0x18] sm:$0xff]   ;;  %v901_v53 = vld [vmem:[%s1193_s3 + $0xe0] sm:$0xff]   ;;  %v905_v57 = vld [vmem:[%s1193_s3 + $0xe8] sm:$0xff]  }
  0x13   :  { %248 = vmatpush1.bf16.msra.mxu0 %v864_v19  ;;  %291 = vmatpush1.bf16.msra.mxu1 %v865_v20  ;;  %v899_v51 = vld [vmem:[%s1193_s3 + $0x98] sm:$0xff]   ;;  %v902_v54 = vld [vmem:[%s1193_s3 + $0x20] sm:$0xff]  }
  0x14   :  { %249 = vmatprep.subr.bf16.mxu0 %v866_v21  ;;  %292 = vmatprep.subr.bf16.mxu1 %v868_v22  ;;  %v903_v55 = vld [vmem:[%s1193_s3 + $0xa0] sm:$0xff]  }
  0x17   :  { %250 = vmatpush1.bf16.msra.mxu0 %v870_v23  ;;  %293 = vmatpush1.bf16.msra.mxu1 %v871_v24 }
  0x18   :  { %251 = vmatprep.subr.bf16.mxu0 %v872_v25  ;;  %294 = vmatprep.subr.bf16.mxu1 %v874_v26 }
  0x1b   :  { %252 = vmatpush1.bf16.msra.mxu0 %v876_v27  ;;  %295 = vmatpush1.bf16.msra.mxu1 %v877_v28 }
  0x1c   :  { %253 = vmatprep.subr.bf16.mxu0 %v878_v29  ;;  %296 = vmatprep.subr.bf16.mxu1 %v880_v30 }
  0x1f   :  { %254 = vmatpush1.bf16.msra.mxu0 %v882_v31  ;;  %297 = vmatpush1.bf16.msra.mxu1 %v883_v32 }
  0x20   :  { %788 = vmatprep.subr.bf16.mxu0 %v884_v35  ;;  %810 = vmatprep.subr.bf16.mxu1 %v885_v36 }
  0x22   :  { %272 = vmatmul.mubr.bf16.vlgmr.msra.gmra.mrb[0].mxu0 %v24_v38  ;;  %315 = vmatmul.mubr.bf16.vlgmr.msra.gmra.mrb[0].mxu1 %v24_v38 }
  0x23   :  { %789 = vmatpush3.bf16.msra.mxu0 %v886_v37  ;;  %811 = vmatpush3.bf16.msra.mxu1 %v887_v39 }
  0x24   :  { %790 = vmatprep.subr.bf16.mxu0 %v888_v40  ;;  %812 = vmatprep.subr.bf16.mxu1 %v889_v41 }
  0x27   :  { %791 = vmatpush3.bf16.msra.mxu0 %v890_v42  ;;  %813 = vmatpush3.bf16.msra.mxu1 %v891_v43 }
  0x28   :  { %792 = vmatprep.subr.bf16.mxu0 %v892_v44  ;;  %814 = vmatprep.subr.bf16.mxu1 %v893_v45 }
  0x2b   :  { %793 = vmatpush3.bf16.msra.mxu0 %v894_v46  ;;  %815 = vmatpush3.bf16.msra.mxu1 %v895_v47 }
  0x2c   :  { %794 = vmatprep.subr.bf16.mxu0 %v896_v48  ;;  %816 = vmatprep.subr.bf16.mxu1 %v897_v49 }
  0x2f   :  { %795 = vmatpush3.bf16.msra.mxu0 %v898_v50  ;;  %817 = vmatpush3.bf16.msra.mxu1 %v899_v51 }
  0x30   :  { %796 = vmatprep.subr.bf16.mxu0 %v900_v52  ;;  %818 = vmatprep.subr.bf16.mxu1 %v901_v53 }
  0x31   :  { %10 = vsyncpa [#allocation4], 0  ;;  %v906_v58 = vld [vmem:[%s1193_s3 + $0x28] sm:$0xff]   ;;  %v908_v60 = vld [vmem:[%s1193_s3 + $0x70] sm:$0xff]   ;;  %v59_v4 = vlaneseq  ;;  %s941_s21 = smov [#allocation3]  }
  0x32   :  { %v907_v59 = vld [vmem:[%s1193_s3 + $0xa8] sm:$0xff]   ;;  %v909_v61 = vld [vmem:[%s1193_s3 + $0xf0] sm:$0xff]   ;;  %v912_v0 = vld [vmem:[%s1193_s3 + $0x78] sm:$0xff]   ;;  %s712_s22 = sshll.u32 %s941_s21, 4  ;;  %s713_s22 = int_to_ptr.vmem [resolvable:$true] %s712_s22 }
  0x33   :  { %797 = vmatpush3.bf16.msra.mxu0 %v902_v54  ;;  %819 = vmatpush3.bf16.msra.mxu1 %v903_v55  ;;  %v910_v62 = vld [vmem:[%s1193_s3 + $0x30] sm:$0xff]   ;;  %v913_v1 = vld [vmem:[%s1193_s3 + $0xf8] sm:$0xff]   ;;  %v60_v5 = vshrl.u32 %v59_v4, 7  ;;  %v57_v8 = vld [vmem:[%s1192_s2] sm:$0xf]  ;;  %s916_s23 = scalar_lea.vmem %s713_s22, 256  ;;  %p921_p1 = scmp.lt.s32.totalorder %s713_s22, %s713_s22 }
  0x34   :  { %798 = vmatprep.subr.bf16.mxu0 %v904_v56  ;;  %820 = vmatprep.subr.bf16.mxu1 %v905_v57  ;;  %v911_v63 = vld [vmem:[%s1193_s3 + $0xb0] sm:$0xff]   ;;  %v914_v2 = vld [vmem:[%s1193_s3 + $0x38] sm:$0xff]   ;;  %v787_v51 = vld [vmem:[%s1194_s4] ss:$0 sm:$0xff]  ;;  %p917_p0 = scmp.ne.s32.totalorder %s713_s22, %s916_s23  ;;  %p922_p2 = scmp.lt.s32.totalorder %s916_s23, %s916_s23 }
  0x35   :  { %v915_v3 = vld [vmem:[%s1193_s3 + $0xb8] sm:$0xff]   ;;  %v61_v6 = vsub.s32 0, %v60_v5  ;;  %v69_v7 = vsub.s32 2, %v60_v5  ;;  %v65_v9 = vsub.s32 1, %v60_v5  ;;  %v73_v10 = vsub.s32 3, %v60_v5 }
  0x36   :  { %p923_p3 = por %p922_p2, %p921_p1 }
  0x37   :  { %799 = vmatpush3.bf16.msra.mxu0 %v906_v58  ;;  %821 = vmatpush3.bf16.msra.mxu1 %v907_v59  ;;  %v62_v11 = vrot.slane %v57_v8, %v61_v6  ;;  %v70_v12 = vrot.slane %v57_v8, %v69_v7  ;;  %v66_v13 = vrot.slane %v57_v8, %v65_v9 }
  0x38   :  { %800 = vmatprep.subr.bf16.mxu0 %v908_v60  ;;  %822 = vmatprep.subr.bf16.mxu1 %v909_v61  ;;  %v74_v14 = vrot.slane %v57_v8, %v73_v10  ;;  %p924_p4 = pnand %p923_p3, %p917_p0 }
  0x3b   :  { %801 = vmatpush3.bf16.msra.mxu0 %v910_v62  ;;  %823 = vmatpush3.bf16.msra.mxu1 %v911_v63 }
  0x3c   :  { %802 = vmatprep.subr.bf16.mxu0 %v912_v0  ;;  %824 = vmatprep.subr.bf16.mxu1 %v913_v1 }
  0x3f   :  { %803 = vmatpush3.bf16.msra.mxu0 %v914_v2  ;;  %825 = vmatpush3.bf16.msra.mxu1 %v915_v3 }
  0xf5   :  { %v273_v15 = vpop.f32.mrb[0].mxu0  ;;  %v316_v16 = vpop.f32.mrb[0].mxu1 }
  0xf6   :  { %v274_v17 = vadd.f32 %v273_v15, %v62_v11  ;;  %v317_v18 = vadd.f32 %v316_v16, %v70_v12  ;;  %v275_v19 = vpop.f32.mrb[1].mxu0  ;;  %v318_v20 = vpop.f32.mrb[1].mxu1 }
  0xf7   :  { %v276_v21 = vadd.f32 %v275_v19, %v66_v13  ;;  %v319_v22 = vadd.f32 %v318_v20, %v74_v14  ;;  %v277_v23 = vpop.f32.mrb[2].mxu0  ;;  %v320_v24 = vpop.f32.mrb[2].mxu1 }
  0xf8   :  { %v278_v25 = vadd.f32 %v277_v23, %v62_v11  ;;  %v321_v26 = vadd.f32 %v320_v24, %v70_v12  ;;  %v279_v27 = vpop.f32.mrb[3].mxu0  ;;  %v322_v28 = vpop.f32.mrb[3].mxu1  ;;  %v325_v31 = vmax.f32 %v274_v17, 0.0  ;;  %v327_v32 = vmax.f32 %v317_v18, 0.0 }
  0xf9   :  { %v280_v29 = vadd.f32 %v279_v27, %v66_v13  ;;  %v323_v30 = vadd.f32 %v322_v28, %v74_v14  ;;  %v326_v35 = vmax.f32 %v276_v21, 0.0  ;;  %v328_v36 = vmax.f32 %v319_v22, 0.0 }
  0xfa   :  { %v329_v33 = vmax.f32 %v278_v25, 0.0  ;;  %v331_v34 = vmax.f32 %v321_v26, 0.0 }
  0xfb   :  { %v330_v37 = vmax.f32 %v280_v29, 0.0  ;;  %v332_v38 = vmax.f32 %v323_v30, 0.0 }
  0xfc   :  { %v333_v39 = vpack.c.bf16 %v329_v33, %v325_v31  ;;  %v335_v40 = vpack.c.bf16 %v331_v34, %v327_v32 }
  0xfd   :  { %v334_v41 = vpack.c.bf16 %v330_v37, %v326_v35  ;;  %v336_v42 = vpack.c.bf16 %v332_v38, %v328_v36 }
  0xff   :  { %625 = vmatprep.mubr.bf16.mxu0 %v334_v41  ;;  %666 = vmatprep.mubr.bf16.mxu1 %v336_v42 }
 0x100   :  { %626 = vmatmul.mubr.bf16.vlgmr.msra.gmra.mrb[4].mxu0 %v333_v39  ;;  %667 = vmatmul.mubr.bf16.vlgmr.msra.gmra.mrb[4].mxu1 %v335_v40 }
 0x1d3   :  { %v804_v43 = vpop.f32.mrb[4].mxu0  ;;  %v826_v44 = vpop.f32.mrb[4].mxu1 }
 0x1d4   :  { %v805_v45 = vpop.f32.mrb[5].mxu0  ;;  %v827_v46 = vpop.f32.mrb[5].mxu1 }
 0x1d5   :  { %v806_v47 = vadd.f32 %v805_v45, %v804_v43  ;;  %v828_v48 = vadd.f32 %v827_v46, %v826_v44  ;;  %v807_v49 = vpop.f32.mrb[6].mxu0  ;;  %v829_v50 = vpop.f32.mrb[6].mxu1 }
 0x1d6   :  { %v808_v52 = vpop.f32.mrb[7].mxu0  ;;  %v830_v53 = vpop.f32.mrb[7].mxu1 }
 0x1d7   :  { %v669_v54 = vadd.f32 %v828_v48, %v806_v47  ;;  %v809_v55 = vadd.f32 %v808_v52, %v807_v49  ;;  %v831_v56 = vadd.f32 %v830_v53, %v829_v50 }
 0x1d9   :  { %v703_v57 = vadd.f32 %v787_v51, %v669_v54  ;;  %v672_v58 = vadd.f32 %v831_v56, %v809_v55 }
 0x1db   :  { %705 = vst [vmem:[#allocation3] sm:$0xff] %v703_v57  ;;  %v704_v59 = vadd.f32 %v787_v51, %v672_v58 }
 0x1dd   :  { %706 = vst [vmem:[#allocation3 + $0x8] sm:$0xff] %v704_v59 }
 0x1de   :  { %927 = shalt.err (!%p924_p4)
}
 0x1df   :  { %s928_s25 = scalar_lea.hbm %s1195_s5, 256 }
 0x1e0   :  { %p929_p5 = scmp.ne.s32.totalorder %s1195_s5, %s928_s25  ;;  %p932_p6 = scmp.lt.u32.totalorder %s928_s25, %s1195_s5 }
 0x1e2   :  { %p934_p7 = pnand %p932_p6, %p929_p5 }
 0x1e4   :  { %937 = shalt.err (!%p934_p7)
}
 0x1e5   :  { %s942_s30 = smov 128   ;;  %s943_s6 = smov 8  }
 0x1e6   :  { %718 = dma.vmem_to_hbm [thread:$0]  %s713_s22, 256, %s1195_s5, [#allocation4], %s942_s30, %s942_s30, %s943_s6  }
 0x1e7   :  { %938 = dma.done.wait [#allocation4], 256  }
 0x1e8   :  { %939 = vsyncadd [#allocation4], 4294967040 }
 0x1e9   :  { %722 = vsyncpa [#allocation4], 1 }

</bundles_post_ra>
